<compile_context>
chip_gen: v5e
topology: v5e:2x2
jax: 0.10.0
libtpu: 0.0.40
codegen_flags: <defaults>
</compile_context>

<pallas_src>
import functools
import math

import jax
import jax.numpy as jnp
from jax.experimental import pallas as pl
from jax.experimental.pallas import tpu as pltpu


def _round_up(x: int, m: int) -> int:
    return ((x + m - 1) // m) * m


def _pick_tm(B: int, cap: int = 256) -> int:
    """Batch tile: multiple of 16 (bf16 sublanes), <= cap, minimal steps then minimal padding."""
    n_steps = max(1, -(-B // cap))
    tm = _round_up(-(-B // n_steps), 16)
    return min(cap, tm)


def _vmem_capacity_bytes() -> int:
    try:
        info = pltpu.get_tpu_info()
        cap = getattr(info, "vmem_capacity_bytes", None)
        if cap:
            return int(cap)
    except Exception:
        pass
    return 64 << 20  # conservative fallback (v7x per-TensorCore VMEM)


def _ensemble_mlp_kernel(x_ref, *refs, n_layers: int, activate_final: bool):
    """Fused MLP for one ensemble member / one batch tile. Everything lives in VMEM.

    refs = (w0, b0, w1, b1, ..., w_{L-1}, b_{L-1}, o_ref).
    Weights/activations are bf16 into the MXU, accumulation + epilogue in f32.
    """
    o_ref = refs[-1]
    h = x_ref[...]                                    # bf16 (tm, D0_pad)
    for i in range(n_layers):
        w = refs[2 * i][...]                          # bf16 (Din_pad_i, Dout_pad_i)
        b = refs[2 * i + 1][...]                      # f32  (1, Dout_pad_i)
        acc = jnp.dot(h, w, preferred_element_type=jnp.float32) + b   # f32 epilogue
        if i < n_layers - 1 or activate_final:
            acc = jnp.maximum(acc, 0.0)
        h = acc.astype(jnp.bfloat16) if i < n_layers - 1 else acc
    o_ref[...] = h.astype(o_ref.dtype)


def ensemble_mlp_forward(x, weights, biases, *, activate_final: bool = False,
                         logical_dims=None):
    """Run the whole ensemble MLP in a single fused Pallas call.

    x:       (B, D0)                                   f32 input (unpadded)
    weights: list of (E, Din_pad_i, Dout_pad_i) bf16   zero-padded, 128-aligned dims
    biases:  list of (E, 1, Dout_pad_i)         f32    zero-padded
    logical_dims: optional [(fan_in, fan_out), ...] for an honest cost estimate
    returns: (E, B_pad, Dout_pad_last) f32  (caller slices back to logical shape)
    """
    E = weights[0].shape[0]
    n_layers = len(weights)
    B = x.shape[0]
    D0_pad = weights[0].shape[1]
    Dout_pad = weights[-1].shape[2]

    tm = _pick_tm(B)
    B_pad = _round_up(B, tm)

    x = x.astype(jnp.float32)
    if x.shape != (B_pad, D0_pad):
        x = jnp.pad(x, ((0, B_pad - B), (0, D0_pad - x.shape[1])))
    x = x.astype(jnp.bfloat16)   # halves x DMA; it feeds a bf16 MXU dot anyway

    # ---- VMEM budgeting -------------------------------------------------------
    w_bytes = sum(w.shape[1] * w.shape[2] * 2 for w in weights)   # bf16, per member
    b_bytes = sum(b.shape[2] * 4 for b in biases)                 # f32, per member
    x_tile_bytes = 2 * tm * D0_pad * 2                            # double-buffered bf16
    out_tile_bytes = 2 * tm * Dout_pad * 4                        # double-buffered f32
    act_bytes = 2 * tm * max(w.shape[2] for w in weights) * 4     # live f32 activation
    headroom = 4 << 20

    vmem_cap = max(int(0.85 * _vmem_capacity_bytes()), 32 << 20)
    double_buf_need = 2 * (w_bytes + b_bytes) + x_tile_bytes + out_tile_bytes + act_bytes + headroom
    single_buffer_weights = double_buf_need > vmem_cap            # v7x economy path
    wb_factor = 1 if single_buffer_weights else 2
    needed = wb_factor * (w_bytes + b_bytes) + x_tile_bytes + out_tile_bytes + act_bytes + headroom
    # TODO(synk): if `needed` still exceeds vmem_cap, tile the widest layer's output (N)
    # dimension inside the kernel (or split layers across two pallas_calls) instead of
    # relying on the compiler; not needed for typical critic-MLP sizes.
    vmem_limit = int(min(max(needed, 32 << 20), vmem_cap))

    # ---- Specs ----------------------------------------------------------------
    grid = (E, B_pad // tm)   # inner axis = batch tiles -> weights stay VMEM-resident per member

    def _param_spec(din, dout, is_bias):
        kw = {}
        if single_buffer_weights:
            kw["pipeline_mode"] = pl.Buffered(1)   # block index constant over inner axis
        if is_bias:
            return pl.BlockSpec((None, 1, dout), lambda e, m: (e, 0, 0), **kw)
        return pl.BlockSpec((None, din, dout), lambda e, m: (e, 0, 0), **kw)

    in_specs = [pl.BlockSpec((tm, D0_pad), lambda e, m: (m, 0))]   # x shared by all members
    flat_params = []
    for w, b in zip(weights, biases):
        din, dout = w.shape[1], w.shape[2]
        in_specs.append(_param_spec(din, dout, is_bias=False))
        in_specs.append(_param_spec(din, dout, is_bias=True))
        flat_params.append(w)
        flat_params.append(b)

    out_specs = pl.BlockSpec((None, tm, Dout_pad), lambda e, m: (e, m, 0))
    out_shape = jax.ShapeDtypeStruct((E, B_pad, Dout_pad), jnp.float32)

    # ---- Cost estimate (logical dims when available) --------------------------
    if logical_dims is not None:
        flops = 2 * E * B * sum(a * b for a, b in logical_dims)
        bytes_accessed = (
            B * logical_dims[0][0] * 4
            + E * sum(a * b * 2 + b * 4 for a, b in logical_dims)
            + E * B * logical_dims[-1][1] * 4
        )
    else:
        flops = 2 * E * B_pad * sum(w.shape[1] * w.shape[2] for w in weights)
        bytes_accessed = (
            x.size * 2
            + sum(w.size * 2 + b.size * 4 for w, b in zip(weights, biases))
            + E * B_pad * Dout_pad * 4
        )

    kernel = functools.partial(
        _ensemble_mlp_kernel, n_layers=n_layers, activate_final=activate_final
    )

    return pl.pallas_call(
        kernel,
        out_shape=out_shape,
        grid_spec=pltpu.PrefetchScalarGridSpec(
            num_scalar_prefetch=0,
            grid=grid,
            in_specs=in_specs,
            out_specs=out_specs,
        ),
        compiler_params=pltpu.CompilerParams(
            dimension_semantics=("parallel", "parallel"),
            vmem_limit_bytes=vmem_limit,
        ),
        cost_estimate=pl.CostEstimate(
            flops=flops, transcendentals=0, bytes_accessed=bytes_accessed
        ),
    )(x, *flat_params)


class PallasEnsembleMLP:
    """Mirror of PyTorch EnsembleMLP: E independent MLPs (activate_final=False),
    outputs stacked along a leading ensemble axis -> (E, B, output_dim)."""

    def __init__(self, input_dim, hidden_dims, output_dim, ensemble_size=2, key=None):
        if key is None:
            key = jax.random.PRNGKey(0)
        self.input_dim = input_dim
        self.output_dim = output_dim
        self.ensemble_size = ensemble_size

        dims = [input_dim] + list(hidden_dims) + [output_dim]
        dims_pad = [_round_up(d, 128) for d in dims]      # lane-dense feature dims
        self.logical_dims = [(dims[i], dims[i + 1]) for i in range(len(dims) - 1)]

        self.raw_params = []     # [(W (E, fan_in, fan_out) f32, b (E, fan_out) f32), ...]
        self.weights_pad = []    # [(E, Din_pad, Dout_pad) bf16, ...]
        self.biases_pad = []     # [(E, 1, Dout_pad) f32, ...]
        for i in range(len(dims) - 1):
            fan_in, fan_out = dims[i], dims[i + 1]
            # PyTorch nn.Linear default init: U(-1/sqrt(fan_in), 1/sqrt(fan_in)).
            bound = 1.0 / math.sqrt(fan_in)
            key, wk, bk = jax.random.split(key, 3)
            w = jax.random.uniform(
                wk, (ensemble_size, fan_in, fan_out), jnp.float32, -bound, bound
            )
            b = jax.random.uniform(
                bk, (ensemble_size, fan_out), jnp.float32, -bound, bound
            )
            self.raw_params.append((w, b))

            w_pad = (
                jnp.zeros((ensemble_size, dims_pad[i], dims_pad[i + 1]), jnp.float32)
                .at[:, :fan_in, :fan_out].set(w)
            ).astype(jnp.bfloat16)                       # bf16 weights for the MXU
            b_pad = (
                jnp.zeros((ensemble_size, 1, dims_pad[i + 1]), jnp.float32)
                .at[:, 0, :fan_out].set(b)
            )                                            # biases stay f32 (epilogue)
            self.weights_pad.append(w_pad)
            self.biases_pad.append(b_pad)

    def __call__(self, x):
        B = x.shape[0]
        out_pad = ensemble_mlp_forward(
            x, self.weights_pad, self.biases_pad,
            activate_final=False, logical_dims=self.logical_dims,
        )
        # Slice padded batch rows / feature lanes back to logical shape (E, B, out_dim).
        return out_pad[:, :B, : self.output_dim]


def reference_ensemble_mlp_f32(x, raw_params):
    """Pure-f32 JAX reference matching PyTorch EnsembleMLP.forward (activate_final=False)."""
    n_layers = len(raw_params)
    E = raw_params[0][0].shape[0]
    outs = []
    for e in range(E):
        h = x
        for i, (w, b) in enumerate(raw_params):
            h = h @ w[e] + b[e]
            if i != n_layers - 1:
                h = jnp.maximum(h, 0.0)
        outs.append(h[None])
    return jnp.concatenate(outs, axis=0)


def reference_ensemble_mlp_bf16(x, raw_params):
    """Precision-matched reference: bf16 operands into each dot, f32 accumulation/epilogue."""
    n_layers = len(raw_params)
    E = raw_params[0][0].shape[0]
    outs = []
    for e in range(E):
        h = x.astype(jnp.float32)
        for i, (w, b) in enumerate(raw_params):
            acc = jnp.dot(h.astype(jnp.bfloat16), w[e].astype(jnp.bfloat16),
                          preferred_element_type=jnp.float32) + b[e]
            if i != n_layers - 1:
                acc = jnp.maximum(acc, 0.0)
            h = acc
        outs.append(h[None])
    return jnp.concatenate(outs, axis=0)


if __name__ == "__main__":
    key = jax.random.PRNGKey(0)
    xkey, pkey = jax.random.split(key)

    batch = 4
    input_dim = 16
    hidden_dims = [32, 32]
    output_dim = 8
    ensemble_size = 2

    x = jax.random.normal(xkey, (batch, input_dim), jnp.float32)

    model = PallasEnsembleMLP(
        input_dim, hidden_dims, output_dim, ensemble_size=ensemble_size, key=pkey
    )

    out = model(x)
    out = jax.block_until_ready(out)
    assert out.shape == (ensemble_size, batch, output_dim), out.shape

    # Precision-matched check (bf16 operands, f32 accumulate) -- should be very tight.
    ref_bf16 = reference_ensemble_mlp_bf16(x, model.raw_params)
    assert jnp.allclose(out, ref_bf16, atol=1e-3, rtol=1e-3), (
        "Pallas EnsembleMLP mismatch vs bf16-matched reference")

    # Sanity check against the pure-f32 PyTorch-semantics reference (looser: bf16 rounding).
    ref_f32 = reference_ensemble_mlp_f32(x, model.raw_params)
    assert jnp.allclose(out, ref_f32, atol=3e-2, rtol=3e-2), (
        "Pallas EnsembleMLP mismatch vs f32 reference")

    print("KERNEL_OK")
</pallas_src>

<mosaic_0001>
module attributes {stable_mosaic.version = 11 : i64} {
  func.func @_ensemble_mlp_kernel(%arg0: i32, %arg1: i32, %arg2: memref<16x128xbf16, #tpu.memory_space<vmem>>, %arg3: memref<1x128x128xbf16, #tpu.memory_space<vmem>>, %arg4: memref<1x1x128xf32, #tpu.memory_space<vmem>>, %arg5: memref<1x128x128xbf16, #tpu.memory_space<vmem>>, %arg6: memref<1x1x128xf32, #tpu.memory_space<vmem>>, %arg7: memref<1x128x128xbf16, #tpu.memory_space<vmem>>, %arg8: memref<1x1x128xf32, #tpu.memory_space<vmem>>, %arg9: memref<1x16x128xf32, #tpu.memory_space<vmem>>) attributes {dimension_semantics = [#tpu.dimension_semantics<parallel>, #tpu.dimension_semantics<parallel>], iteration_bounds = array<i64: 2, 1>, scalar_prefetch = 0 : i64, scratch_operands = 0 : i64, tpu.core_type = #tpu.core_type<tc>, window_params = [{transform_indices = @transform_0, window_bounds = array<i64: 16, 128>}, {transform_indices = @transform_1, window_bounds = array<i64: 1, 128, 128>}, {transform_indices = @transform_2, window_bounds = array<i64: 1, 1, 128>}, {transform_indices = @transform_3, window_bounds = array<i64: 1, 128, 128>}, {transform_indices = @transform_4, window_bounds = array<i64: 1, 1, 128>}, {transform_indices = @transform_5, window_bounds = array<i64: 1, 128, 128>}, {transform_indices = @transform_6, window_bounds = array<i64: 1, 1, 128>}, {transform_indices = @transform_7, window_bounds = array<i64: 1, 16, 128>}]} {
    %c0 = arith.constant 0 : index
    %c0_0 = arith.constant 0 : index
    %0 = vector.load %arg2[%c0, %c0_0] : memref<16x128xbf16, #tpu.memory_space<vmem>>, vector<16x128xbf16>
    %c0_1 = arith.constant 0 : index
    %c0_2 = arith.constant 0 : index
    %c0_3 = arith.constant 0 : index
    %1 = vector.load %arg3[%c0_1, %c0_2, %c0_3] : memref<1x128x128xbf16, #tpu.memory_space<vmem>>, vector<1x128x128xbf16>
    %2 = vector.shape_cast %1 : vector<1x128x128xbf16> to vector<128x128xbf16>
    %c0_4 = arith.constant 0 : index
    %c0_5 = arith.constant 0 : index
    %c0_6 = arith.constant 0 : index
    %3 = vector.load %arg4[%c0_4, %c0_5, %c0_6] : memref<1x1x128xf32, #tpu.memory_space<vmem>>, vector<1x1x128xf32>
    %4 = vector.shape_cast %3 : vector<1x1x128xf32> to vector<1x128xf32>
    %cst = arith.constant dense<0.000000e+00> : vector<16x128xf32>
    %5 = tpu.matmul %0, %2, %cst {dimension_numbers = #tpu.dot_dimension_numbers<[1], [0], [0], [1], [0, 0, 1, 1], [], []>} : vector<16x128xbf16>, vector<128x128xbf16>, vector<16x128xf32> -> vector<16x128xf32>
    %6 = vector.broadcast %4 : vector<1x128xf32> to vector<16x128xf32>
    %7 = arith.addf %5, %6 : vector<16x128xf32>
    %cst_7 = arith.constant 0.000000e+00 : f32
    %8 = vector.broadcast %cst_7 : f32 to vector<16x128xf32>
    %9 = arith.maximumf %7, %8 : vector<16x128xf32>
    %10 = arith.truncf %9 : vector<16x128xf32> to vector<16x128xbf16>
    %c0_8 = arith.constant 0 : index
    %c0_9 = arith.constant 0 : index
    %c0_10 = arith.constant 0 : index
    %11 = vector.load %arg5[%c0_8, %c0_9, %c0_10] : memref<1x128x128xbf16, #tpu.memory_space<vmem>>, vector<1x128x128xbf16>
    %12 = vector.shape_cast %11 : vector<1x128x128xbf16> to vector<128x128xbf16>
    %c0_11 = arith.constant 0 : index
    %c0_12 = arith.constant 0 : index
    %c0_13 = arith.constant 0 : index
    %13 = vector.load %arg6[%c0_11, %c0_12, %c0_13] : memref<1x1x128xf32, #tpu.memory_space<vmem>>, vector<1x1x128xf32>
    %14 = vector.shape_cast %13 : vector<1x1x128xf32> to vector<1x128xf32>
    %cst_14 = arith.constant dense<0.000000e+00> : vector<16x128xf32>
    %15 = tpu.matmul %10, %12, %cst_14 {dimension_numbers = #tpu.dot_dimension_numbers<[1], [0], [0], [1], [0, 0, 1, 1], [], []>} : vector<16x128xbf16>, vector<128x128xbf16>, vector<16x128xf32> -> vector<16x128xf32>
    %16 = vector.broadcast %14 : vector<1x128xf32> to vector<16x128xf32>
    %17 = arith.addf %15, %16 : vector<16x128xf32>
    %cst_15 = arith.constant 0.000000e+00 : f32
    %18 = vector.broadcast %cst_15 : f32 to vector<16x128xf32>
    %19 = arith.maximumf %17, %18 : vector<16x128xf32>
    %20 = arith.truncf %19 : vector<16x128xf32> to vector<16x128xbf16>
    %c0_16 = arith.constant 0 : index
    %c0_17 = arith.constant 0 : index
    %c0_18 = arith.constant 0 : index
    %21 = vector.load %arg7[%c0_16, %c0_17, %c0_18] : memref<1x128x128xbf16, #tpu.memory_space<vmem>>, vector<1x128x128xbf16>
    %22 = vector.shape_cast %21 : vector<1x128x128xbf16> to vector<128x128xbf16>
    %c0_19 = arith.constant 0 : index
    %c0_20 = arith.constant 0 : index
    %c0_21 = arith.constant 0 : index
    %23 = vector.load %arg8[%c0_19, %c0_20, %c0_21] : memref<1x1x128xf32, #tpu.memory_space<vmem>>, vector<1x1x128xf32>
    %24 = vector.shape_cast %23 : vector<1x1x128xf32> to vector<1x128xf32>
    %cst_22 = arith.constant dense<0.000000e+00> : vector<16x128xf32>
    %25 = tpu.matmul %20, %22, %cst_22 {dimension_numbers = #tpu.dot_dimension_numbers<[1], [0], [0], [1], [0, 0, 1, 1], [], []>} : vector<16x128xbf16>, vector<128x128xbf16>, vector<16x128xf32> -> vector<16x128xf32>
    %26 = vector.broadcast %24 : vector<1x128xf32> to vector<16x128xf32>
    %27 = arith.addf %25, %26 : vector<16x128xf32>
    %c0_23 = arith.constant 0 : index
    %c0_24 = arith.constant 0 : index
    %c0_25 = arith.constant 0 : index
    %28 = vector.load %arg9[%c0_23, %c0_24, %c0_25] : memref<1x16x128xf32, #tpu.memory_space<vmem>>, vector<1x16x128xf32>
    %29 = vector.shape_cast %28 : vector<1x16x128xf32> to vector<16x128xf32>
    %30 = vector.shape_cast %27 : vector<16x128xf32> to vector<1x16x128xf32>
    tpu.vector_store %arg9[%c0_23, %c0_24, %c0_25], %30 {strides = array<i32>} : memref<1x16x128xf32, #tpu.memory_space<vmem>>, vector<1x16x128xf32>,
    return
  }
  func.func @transform_0(%arg0: i32, %arg1: i32) -> (i32, i32) {
    %c0_i32 = arith.constant 0 : i32
    %c0_i32_0 = arith.constant 0 : i32
    return %arg1, %c0_i32 : i32, i32
  }
  func.func @transform_1(%arg0: i32, %arg1: i32) -> (i32, i32, i32) {
    %c0_i32 = arith.constant 0 : i32
    %c0_i32_0 = arith.constant 0 : i32
    %c0_i32_1 = arith.constant 0 : i32
    return %arg0, %c0_i32, %c0_i32_0 : i32, i32, i32
  }
  func.func @transform_2(%arg0: i32, %arg1: i32) -> (i32, i32, i32) {
    %c0_i32 = arith.constant 0 : i32
    %c0_i32_0 = arith.constant 0 : i32
    %c0_i32_1 = arith.constant 0 : i32
    return %arg0, %c0_i32, %c0_i32_0 : i32, i32, i32
  }
  func.func @transform_3(%arg0: i32, %arg1: i32) -> (i32, i32, i32) {
    %c0_i32 = arith.constant 0 : i32
    %c0_i32_0 = arith.constant 0 : i32
    %c0_i32_1 = arith.constant 0 : i32
    return %arg0, %c0_i32, %c0_i32_0 : i32, i32, i32
  }
  func.func @transform_4(%arg0: i32, %arg1: i32) -> (i32, i32, i32) {
    %c0_i32 = arith.constant 0 : i32
    %c0_i32_0 = arith.constant 0 : i32
    %c0_i32_1 = arith.constant 0 : i32
    return %arg0, %c0_i32, %c0_i32_0 : i32, i32, i32
  }
  func.func @transform_5(%arg0: i32, %arg1: i32) -> (i32, i32, i32) {
    %c0_i32 = arith.constant 0 : i32
    %c0_i32_0 = arith.constant 0 : i32
    %c0_i32_1 = arith.constant 0 : i32
    return %arg0, %c0_i32, %c0_i32_0 : i32, i32, i32
  }
  func.func @transform_6(%arg0: i32, %arg1: i32) -> (i32, i32, i32) {
    %c0_i32 = arith.constant 0 : i32
    %c0_i32_0 = arith.constant 0 : i32
    %c0_i32_1 = arith.constant 0 : i32
    return %arg0, %c0_i32, %c0_i32_0 : i32, i32, i32
  }
  func.func @transform_7(%arg0: i32, %arg1: i32) -> (i32, i32, i32) {
    %c0_i32 = arith.constant 0 : i32
    %c0_i32_0 = arith.constant 0 : i32
    return %arg0, %arg1, %c0_i32 : i32, i32, i32
  }
}

</mosaic_0001>

<bundles_post_ra>
// kernel: tpu_custom_call.1
= control target key start
LH: loop header
LB: loop body
LE: loop exit
PB: predicated region body
PF: predicated region fallthrough
CT: control target
= control target key end

     0   :  { %s1718_s0 = inlined_call_operand.hbm [shape: bf16[16,128], index: 0, kind: input, shape index: {}]   ;;  %s1719_s1 = inlined_call_operand.hbm [shape: bf16[2,128,128], index: 1, kind: input, shape index: {}]   ;;  %s1720_s2 = inlined_call_operand.hbm [shape: f32[2,1,128], index: 2, kind: input, shape index: {}]   ;;  %s1721_s3 = inlined_call_operand.hbm [shape: bf16[2,128,128], index: 3, kind: input, shape index: {}]   ;;  %s1722_s4 = inlined_call_operand.vmem [shape: f32[2,1,128], index: 4, kind: input, shape index: {}]   ;;  %s1723_s5 = inlined_call_operand.hbm [shape: bf16[2,128,128], index: 5, kind: input, shape index: {}]   ;;  %s1724_s6 = inlined_call_operand.vmem [shape: f32[2,1,128], index: 6, kind: input, shape index: {}]   ;;  %s1725_s7 = inlined_call_operand.hbm [shape: f32[2,16,128], index: 7, kind: output, shape index: {}]  }
   0x1   :  { %1737 = sst [smem:[#allocation22_spill]] %s1718_s0 }
   0x2   :  { %1738 = sst [smem:[#allocation23_spill]] %s1719_s1 }
   0x3   :  { %1739 = sst [smem:[#allocation24_spill]] %s1720_s2 }
   0x4   :  { %1740 = sst [smem:[#allocation25_spill]] %s1721_s3 }
   0x5   :  { %12 = vsyncpa [#allocation3], 0 }
   0x6   :  { %13 = vsyncpa [#allocation6], 0 }
   0x7   :  { %15 = vsyncpa [#allocation6 + $0x1], 0 }
   0x8   :  { %16 = vsyncpa [#allocation9], 0 }
   0x9   :  { %18 = vsyncpa [#allocation9 + $0x1], 0 }
   0xa   :  { %19 = vsyncpa [#allocation4], 0 }
   0xb   :  { %21 = vsyncpa [#allocation4 + $0x1], 0  ;;  %s1472_s24 = smov 0   ;;  %s1474_s25 = smov 0  }
   0xc   :  { %s1476_s26 = smov 0   ;;  %s1478_s27 = smov 0  }
   0xd   :  { %s1480_s28 = smov 0   ;;  %s1482_s29 = smov 0  }
   0xe LB: > { %1741 = sst [smem:[#allocation16_spill]] %s1405_s24  ;;  %s39_s30 = sadd.s32 1, %s1421_s28  ;;  %s1425_s29 = sphi %s1482_s29, %s27_s29   ;;  %s1421_s28 = sphi %s1480_s28, %s1765_s28   ;;  %s1417_s27 = sphi %s1478_s27, %s1764_s27   ;;  %s1413_s26 = sphi %s1476_s26, %s1768_s26   ;;  %s1409_s25 = sphi %s1474_s25, %s1767_s25   ;;  %s1405_s24 = sphi %s1472_s24, %s1766_s24  }
   0xf   : > { %1742 = sst [smem:[#allocation17_spill]] %s1421_s28  ;;  %s72_s8 = sadd.s32 1, %s1413_s26 }
  0x10   : > { %1743 = sst [smem:[#allocation18_spill]] %s1425_s29  ;;  %p41_p0 = scmp.ge.s32.totalorder %s39_s30, 2 }
  0x11   : > { %p79_p1 = scmp.ne.s32.totalorder %s1413_s26, %s1409_s25  ;;  %p80_p2 = scmp.eq.s32.totalorder %s1425_s29, 0 }
  0x12   : > { %s1770_s30 = smov (%p41_p0, %s39_s30), 0  ;;  %p940_p4 = scmp.ge.s32.totalorder %s1425_s29, 2 }
  0x13   : > { %1744 = sst [smem:[#allocation19_spill]] %s1770_s30  ;;  %p1512_p3 = por %p80_p2, %p79_p1 }
  0x14   : > { %s69_s10 = ssub.s32 %s1421_s28, %s1770_s30  ;;  %p1126_p6 = scmp.lt.s32.totalorder %s1425_s29, 2 }
  0x15   : > { %p70_p5 = scmp.eq.s32.totalorder %s69_s10, 0  ;;  %s284_s11 = sand.u32 1, %s1425_s29  }
  0x16   : > { %s1726_s12 = sand.u32 1, %s1413_s26   ;;  %s1530_s15 = sshll.u32 %s1421_s28, 6 }
  0x17   : > { %s1523_s13 = scalar_select %p70_p5, %s1413_s26, %s72_s8  }
  0x18   : > { %s1527_s14 = sshll.u32 %s1726_s12, 6  ;;  %s1747_s1 = sld [smem:[#allocation23_spill]] }
  0x19   : > { %1746 = sst [smem:[#allocation20_spill]] %s1523_s13  ;;  %s288_s19 = scalar_lea.vmem [#allocation5], %s1527_s14 }
  0x1a   : > { %s296_s20 = sshll.u32 %s288_s19, 4  ;;  %p1539_p7 = pnand %p1126_p6, %p1512_p3  ;;  %s297_s20 = int_to_ptr.vmem [resolvable:$true] %s296_s20 }
  0x1b   : > { %s1749_s3 = sld [smem:[#allocation25_spill]]  ;;  %s1547_s16 = scalar_lea.sflag [#allocation6], %s284_s11 }
  0x1c   : > { %s1727_s17 = smov 64   ;;  %s327_s19 = scalar_lea.vmem [#allocation8], %s1527_s14 }
  0x1d   : > { %s335_s23 = sshll.u32 %s327_s19, 4  ;;  %s1556_s8 = scalar_lea.sflag [#allocation9], %s284_s11  ;;  %s336_s23 = int_to_ptr.vmem [resolvable:$true] %s335_s23 }
  0x1e   : > { %s293_s18 = scalar_lea.hbm %s1747_s1, %s1530_s15  ;;  %s1565_s12 = sadd.s32 4294967295, %s1425_s29  }
  0x1f   : > { %s294_s21 = sshll.u32 %s293_s18, 4  ;;  %s1729_s18 = smov 4   ;;  %s295_s21 = int_to_ptr.hbm [resolvable:$true] %s294_s21 }
  0x20   : > { %1111 = dma.hbm_to_vmem [thread:$0]  (!%p1539_p7), %s295_s21, 1024, %s297_s20, %s1547_s16, %s1727_s17, %s1727_s17, %s1729_s18  }
  0x21   : > { %s332_s10 = scalar_lea.hbm %s1749_s3, %s1530_s15  ;;  %s937_s20 = sadd.s32 4294967294, %s1425_s29  }
  0x22   : > { %s333_s9 = sshll.u32 %s332_s10, 4  ;;  %p85_p8 = scmp.ne.s32.totalorder %s1409_s25, %s1405_s24  ;;  %s334_s9 = int_to_ptr.hbm [resolvable:$true] %s333_s9 }
  0x23   : > { %1117 = dma.hbm_to_vmem [thread:$0]  (!%p1539_p7), %s334_s9, 1024, %s336_s23, %s1556_s8, %s1727_s17, %s1727_s17, %s1729_s18  }
  0x24   : > { %p86_p9 = scmp.eq.s32.totalorder %s1565_s12, 0  ;;  %p241_p10 = scmp.eq.s32.totalorder %s1565_s12, 1 }
  0x25   : > { %p247_p11 = scmp.eq.s32.totalorder %s937_s20, 1  ;;  %p938_p13 = scmp.ge.s32.totalorder %s1425_s29, 1 }
  0x26   : > { %p1574_p12 = por %p86_p9, %p85_p8  ;;  %p1582_p0 = por %p241_p10, %p79_p1 }
  0x27   : > { %p1586_p2 = por %p247_p11, %p85_p8  ;;  %p254_p3 = scmp.lt.s32.totalorder %s1425_s29, 3 }
  0x28   : > { %s1754_s0 = sld [smem:[#allocation22_spill]]  ;;  %s1429_s17 = smov [#allocation2]  }
  0x29   : > { %s1752_s10 = scalar_select %p1586_p2, 1, 0 }
  0x2a   : > { %p1594_p5 = pnand %p938_p13, %p254_p3  ;;  %s270_s18 = sshll.u32 %s1429_s17, 4  ;;  %s271_s18 = int_to_ptr.vmem [resolvable:$true] %s270_s18 }
  0x2b   : > { %1753 = sst [smem:[#allocation21_spill]] %s1752_s10  ;;  %s1757_s19 = sand.u32 1, %s1413_s26  }
  0x2c   : > { %p1104_p1 = pneg %p1594_p5  ;;  %s1756_s2 = sld [smem:[#allocation24_spill]] }
  0x2d   : > { %s1758_s29 = smov 4   ;;  %s1759_s10 = smov 64  }
  0x2e   : > { %s268_s23 = sshll.u32 %s1754_s0, 4  ;;  %s309_s0 = scalar_lea.vmem [#allocation7], %s1757_s19  ;;  %s269_s23 = int_to_ptr.hbm [resolvable:$true] %s268_s23 }
  0x2f   : > { %s316_s30 = sshll.u32 %s309_s0, 4  ;;  %p1105_p6 = pnand %p1104_p1, %p86_p9  ;;  %s317_s30 = int_to_ptr.vmem [resolvable:$true] %s316_s30 }
  0x30   : > { %s360_s1 = scalar_lea.hbm %s1723_s5, %s1530_s15  ;;  %s355_s3 = scalar_lea.vmem [#allocation10], %s1527_s14 }
  0x31   : > { %1107 = dma.hbm_to_vmem [thread:$0]  (!%p1105_p6), %s269_s23, 128, %s271_s18, [#allocation3], %s1759_s10, %s1759_s10, %s1758_s29  }
  0x32   : > { %s312_s9 = scalar_lea.hbm %s1756_s2, %s1421_s28  ;;  %s363_s2 = sshll.u32 %s355_s3, 4  ;;  %s364_s2 = int_to_ptr.vmem [resolvable:$true] %s363_s2 }
  0x33   : > { %s314_s13 = sshll.u32 %s312_s9, 4  ;;  %s361_s28 = sshll.u32 %s360_s1, 4  ;;  %s315_s13 = int_to_ptr.hbm [resolvable:$true] %s314_s13  ;;  %s362_s28 = int_to_ptr.hbm [resolvable:$true] %s361_s28 }
  0x34   : > { %1114 = dma.hbm_to_vmem [thread:$0]  (!%p1539_p7), %s315_s13, 16, %s317_s30, %s1547_s16  }
  0x35   : > { %1120 = dma.hbm_to_vmem [thread:$0]  (!%p1539_p7), %s362_s28, 1024, %s364_s2, %s1556_s8, %s1759_s10, %s1759_s10, %s1758_s29  }
  0x36   : > { %381 = sbr.rel (%p1594_p5) target bundleno = 525 (0x20d), region = 48 }
  0x3b   : > { %1388 = dma.done.wait (%p86_p9), [#allocation3], 128  }
  0x3c   : > { %1390 = vsyncadd (%p86_p9), [#allocation3], 4294967168  ;;  %s388_s0 = sand.u32 1, %s1565_s12   ;;  %s1633_s24 = sand.u32 1, %s1409_s25  }
  0x3d   : > { %s1636_s30 = sshll.u32 %s1633_s24, 6  ;;  %s389_s2 = scalar_lea.sflag [#allocation6], %s388_s0 }
  0x3e   : > { %s392_s28 = scalar_lea.vmem [#allocation5], %s1636_s30 }
  0x3f   : > { %1392 = dma.done.wait (%p1574_p12), %s389_s2, 1040  }
  0x40   : > { %1394 = vsyncadd (%p1574_p12), %s389_s2, 4294966256  ;;  %s401_s29 = scalar_lea.vmem [#allocation7], %s1633_s24  ;;  %s408_s13 = scalar_lea.sflag [#allocation9], %s388_s0 }
  0x41   : > { %s1645_s14 = scalar_lea.vmem [#allocation8], %s1636_s30 }
  0x42   : > { %1396 = dma.done.wait (%p1574_p12), %s408_s13, 2048  }
  0x43   : > { %1398 = vsyncadd (%p1574_p12), %s408_s13, 4294965248  ;;  %v1072_v0 = vld [vmem:[%s392_s28 + $0x38] sm:$0xff]  ;;  %v1071_v1 = vld [vmem:[%s392_s28 + $0x30] sm:$0xff]  ;;  %p474_p7 = scmp.lt.s32.totalorder %s1417_s27, 1  ;;  %s421_s18 = scalar_lea.vmem [#allocation10], %s1636_s30 }
  0x44   : > { %557 = vmatpush.bf16.msra.mxu0 %v1072_v0  ;;  %v1080_v2 = vld [vmem:[%s1645_s14 + $0x38] sm:$0xff]  ;;  %v1079_v3 = vld [vmem:[%s1645_s14 + $0x30] sm:$0xff]  ;;  %v1070_v4 = vld [vmem:[%s392_s28 + $0x28] sm:$0xff]  ;;  %s955_s9 = sshll.u32 %s1633_s24, 4  ;;  %s1089_s19 = sshll.u32 %s1417_s27, 4 }
  0x45   : > { %642 = vmatpush.bf16.msra.mxu1 %v1080_v2  ;;  %v1078_v5 = vld [vmem:[%s1645_s14 + $0x28] sm:$0xff]  ;;  %v1069_v6 = vld [vmem:[%s392_s28 + $0x20] sm:$0xff]  ;;  %v1068_v8 = vld [vmem:[%s392_s28 + $0x18] sm:$0xff]  ;;  %s1657_s12 = scalar_select %p474_p7, %s1417_s27, 1 }
  0x46   : > { %v1077_v7 = vld [vmem:[%s1645_s14 + $0x20] sm:$0xff]  ;;  %v1067_v9 = vld [vmem:[%s392_s28 + $0x10] sm:$0xff]  ;;  %v1064_v12 = vld [vmem:[#allocation2] sm:$0xff]  ;;  %s757_s3 = scalar_lea.hbm %s1725_s7, %s1089_s19  ;;  %s472_s0 = scalar_lea.vmem [#allocation11], %s955_s9 }
  0x47   : > { %v1066_v10 = vld [vmem:[%s392_s28 + $0x8] sm:$0xff]  ;;  %v1065_v11 = vld [vmem:[%s392_s28] sm:$0xff]  ;;  %s476_s16 = scalar_lea.vmem %s1722_s4, %s1657_s12  ;;  %v1075_v14 = vld [vmem:[%s1645_s14 + $0x10] sm:$0xff]  ;;  %s479_s10 = scalar_lea.vmem %s1724_s6, %s1657_s12 }
  0x48   : > { %558 = vmatpush.bf16.msra.mxu0 %v1071_v1  ;;  %v1076_v13 = vld [vmem:[%s1645_s14 + $0x18] sm:$0xff]  ;;  %v1074_v15 = vld [vmem:[%s1645_s14 + $0x8] sm:$0xff]  ;;  %v1073_v16 = vld [vmem:[%s1645_s14] sm:$0xff]  ;;  %s758_s30 = sshll.u32 %s472_s0, 4  ;;  %s760_s2 = sshll.u32 %s757_s3, 4  ;;  %s759_s30 = int_to_ptr.vmem [resolvable:$true] %s758_s30  ;;  %s761_s2 = int_to_ptr.hbm [resolvable:$true] %s760_s2 }
  0x49   : > { %643 = vmatpush.bf16.msra.mxu1 %v1079_v3  ;;  %v1088_v17 = vld [vmem:[%s421_s18 + $0x38] sm:$0xff]  ;;  %v1087_v18 = vld [vmem:[%s421_s18 + $0x30] sm:$0xff]  ;;  %v1086_v19 = vld [vmem:[%s421_s18 + $0x28] sm:$0xff]  ;;  %s744_s28 = scalar_lea.sflag [#allocation4], %s1633_s24  ;;  %s1355_s12 = scalar_lea.hbm %s1725_s7, 32 }
  0x4a   : > { %727 = vmatpush.bf16.msra.mxu2 %v1088_v17  ;;  %v1085_v20 = vld [vmem:[%s421_s18 + $0x20] sm:$0xff]  ;;  %v1182_v22 = vld [vmem:[%s401_s29] ss:$0 sm:$0xff]  ;;  %v1084_v29 = vld [vmem:[%s421_s18 + $0x18] sm:$0xff]  ;;  %s1349_s29 = sshra.s32 %s761_s2, 4  ;;  %s1350_s29 = int_to_ptr.hbm [resolvable:$true] %s1349_s29 }
  0x4b   : > { %v1083_v30 = vld [vmem:[%s421_s18 + $0x10] sm:$0xff]  ;;  %v1082_v31 = vld [vmem:[%s421_s18 + $0x8] sm:$0xff]  ;;  %v1081_v32 = vld [vmem:[%s421_s18] sm:$0xff]  ;;  %s1351_s27 = scalar_lea.hbm %s1350_s29, 16  ;;  %p1356_p11 = scmp.lt.s32.totalorder %s1350_s29, %s1725_s7 }
  0x4c   : > { %559 = vmatpush.bf16.msra.mxu0 %v1070_v4  ;;  %v1183_v34 = vld [vmem:[%s476_s16] ss:$0 sm:$0xff]  ;;  %p1352_p8 = scmp.ne.s32.totalorder %s1350_s29, %s1351_s27  ;;  %p1357_p12 = scmp.lt.s32.totalorder %s1355_s12, %s1351_s27 }
  0x4d   : > { %644 = vmatpush.bf16.msra.mxu1 %v1078_v5  ;;  %v1184_v41 = vld [vmem:[%s479_s10] ss:$0 sm:$0xff] }
  0x4e   : > { %728 = vmatpush.bf16.msra.mxu2 %v1087_v18  ;;  %p1353_p9 = pnand %p1352_p8, %p1582_p0  ;;  %p1358_p13 = por %p1357_p12, %p1356_p11 }
  0x50   : > { %560 = vmatpush.bf16.msra.mxu0 %v1069_v6  ;;  %p1354_p10 = pneg %p1353_p9 }
  0x51   : > { %645 = vmatpush.bf16.msra.mxu1 %v1077_v7 }
  0x52   : > { %729 = vmatpush.bf16.msra.mxu2 %v1086_v19  ;;  %p1359_p3 = pnand %p1358_p13, %p1354_p10 }
  0x54   : > { %561 = vmatpush.bf16.msra.mxu0 %v1068_v8 }
  0x55   : > { %646 = vmatpush.bf16.msra.mxu1 %v1076_v13 }
  0x56   : > { %730 = vmatpush.bf16.msra.mxu2 %v1085_v20 }
  0x58   : > { %562 = vmatpush.bf16.msra.mxu0 %v1067_v9 }
  0x59   : > { %647 = vmatpush.bf16.msra.mxu1 %v1075_v14 }
  0x5a   : > { %731 = vmatpush.bf16.msra.mxu2 %v1084_v29 }
  0x5c   : > { %563 = vmatpush.bf16.msra.mxu0 %v1066_v10 }
  0x5d   : > { %648 = vmatpush.bf16.msra.mxu1 %v1074_v15 }
  0x5e   : > { %732 = vmatpush.bf16.msra.mxu2 %v1083_v30 }
  0x60   : > { %564 = vmatpush.bf16.msra.mxu0 %v1065_v11 }
  0x61   : > { %649 = vmatpush.bf16.msra.mxu1 %v1073_v16 }
  0x62   : > { %733 = vmatpush.bf16.msra.mxu2 %v1082_v31 }
  0x63   : > { %565 = vmatmul.bf16.vlgmr.msra.gmra.mxu0 %v1064_v12 }
  0x66   : > { %734 = vmatpush.bf16.msra.mxu2 %v1081_v32 }
  0xe0   : > { %v566_v21 = vpop.f32.mrf.mxu0 }
  0xe1   : > { %v567_v23 = vadd.f32 %v1182_v22, %v566_v21 }
  0xe3   : > { %v571_v26 = vmax.f32 %v567_v23, 0.0 }
  0xe8   : > { %v568_v24 = vpop.f32.mrf.mxu0 }
  0xe9   : > { %v569_v25 = vadd.f32 %v1182_v22, %v568_v24 }
  0xeb   : > { %v572_v27 = vmax.f32 %v569_v25, 0.0 }
  0xed   : > { %v573_v28 = vpack.c.bf16 %v572_v27, %v571_v26 }
  0xef   : > { %650 = vmatmul.bf16.vlgmr.msra.gmra.mxu1 %v573_v28 }
 0x16c   : > { %v651_v33 = vpop.f32.mrf.mxu1 }
 0x16d   : > { %v652_v35 = vadd.f32 %v1183_v34, %v651_v33 }
 0x16f   : > { %v656_v38 = vmax.f32 %v652_v35, 0.0 }
 0x174   : > { %v653_v36 = vpop.f32.mrf.mxu1 }
 0x175   : > { %v654_v37 = vadd.f32 %v1183_v34, %v653_v36 }
 0x177   : > { %v657_v39 = vmax.f32 %v654_v37, 0.0 }
 0x179   : > { %v658_v40 = vpack.c.bf16 %v657_v39, %v656_v38 }
 0x17b   : > { %735 = vmatmul.bf16.vlgmr.msra.gmra.mxu2 %v658_v40 }
 0x1fe   : > { %v736_v42 = vpop.f32.mrf.mxu2 }
 0x1ff   : > { %v737_v43 = vadd.f32 %v1184_v41, %v736_v42 }
 0x201   : > { %741 = vst [vmem:[%s472_s0] sm:$0xff] %v737_v43 }
 0x206   : > { %v738_v44 = vpop.f32.mrf.mxu2 }
 0x207   : > { %v739_v45 = vadd.f32 %v1184_v41, %v738_v44 }
 0x209   : > { %742 = vst [vmem:[%s472_s0 + $0x8] sm:$0xff] %v739_v45 }
 0x20a   : > { %1362 = shalt.err (!%p1359_p3)
}
 0x20b   : > { %s1430_s24 = smov 128   ;;  %s1431_s16 = smov 8  }
 0x20c   : > { %1102 = dma.vmem_to_hbm [thread:$0]  (%p1582_p0), %s759_s30, 256, %s761_s2, %s744_s28, %s1430_s24, %s1430_s24, %s1431_s16  }
 0x20d PF: > { %s1760_s18 = sld [smem:[#allocation16_spill]]  ;;  %p1122_p5 = pnand %p940_p4, %p1586_p2 }
 0x20e   : > { %s1762_s11 = sld [smem:[#allocation18_spill]] }
 0x20f   : > { %p1123_p1 = pneg %p1122_p5 }
 0x213   : > { %s775_s10 = sand.u32 1, %s1760_s18  }
 0x214   : > { %s776_s23 = scalar_lea.sflag [#allocation4], %s775_s10 }
 0x215   : > { %1400 = dma.done.wait (%p1123_p1), %s776_s23, 256  }
 0x216   : > { %1402 = vsyncadd (%p1123_p1), %s776_s23, 4294967040  ;;  %s27_s29 = sadd.s32 1, %s1762_s11   ;;  %s1763_s20 = sld [smem:[#allocation20_spill]] }
 0x217   : > { %p24_p6 = scmp.ge.s32.totalorder %s27_s29, 4   ;;  %s1764_s27 = sld [smem:[#allocation17_spill]] }
 0x218   : > { %s1765_s28 = sld [smem:[#allocation19_spill]]  ;;  %s1766_s24 = smov %s1409_s25 }
 0x219   : > { %s1767_s25 = smov %s1413_s26  ;;  %26 = sbr.rel (!%p24_p6) target bundleno = 14 (0xe), region = 140 }
 0x21c   : > { %s1768_s26 = smov %s1763_s20 }
 0x21e   :  { %782 = vsyncpa [#allocation3], 1 }
 0x21f   :  { %784 = vsyncpa [#allocation3 + $0x1], 1 }
 0x220   :  { %785 = vsyncpa [#allocation6], 1 }
 0x221   :  { %787 = vsyncpa [#allocation6 + $0x1], 1 }
 0x222   :  { %788 = vsyncpa [#allocation9], 1 }
 0x223   :  { %790 = vsyncpa [#allocation9 + $0x1], 1 }
 0x224   :  { %791 = vsyncpa [#allocation4], 1 }
 0x225   :  { %793 = vsyncpa [#allocation4 + $0x1], 1 }

</bundles_post_ra>
